<compile_context>
chip_gen: v7x
topology: tpu7x:2x2x1
jax: 0.10.0
libtpu: 0.0.40
codegen_flags: <defaults>
</compile_context>

<pallas_src>
import functools

import jax
import jax.numpy as jnp
from jax.experimental import pallas as pl
from jax.experimental.pallas import tpu as pltpu


def _vision_op_kernel(m_ref, x_ref, o_ref, *, W: int, do_denorm: bool):
    # m_ref: (2, H*W) float32 lane masks (row 0: j != 0, row 1: j != W-1)
    # x_ref/o_ref: (TB, H*W) lane-dense plane batch.
    x = x_ref[...].astype(jnp.float32)
    if do_denorm:
        x = jnp.clip((x + 1.0) * 0.5, 0.0, 1.0)           # denorm

    TB, HW = x.shape

    # Vertical neighbour sum: flat shifts by +-W.  The zero fill of the
    # concatenate is exactly the zero "same" padding at the top/bottom border.
    zrow = jnp.zeros((TB, W), jnp.float32)
    v = (jnp.concatenate([zrow, x[:, : HW - W]], axis=1)   # x[i-1, j]
         + jnp.concatenate([x[:, W:], zrow], axis=1))      # x[i+1, j]

    # Horizontal neighbours of v: flat shifts by +-1; the row-wrap leakage at
    # the left/right image border is zeroed by the precomputed lane masks.
    zcol = jnp.zeros((TB, 1), jnp.float32)
    left = jnp.concatenate([zcol, v[:, : HW - 1]], axis=1) * m_ref[0:1, :]
    right = jnp.concatenate([v[:, 1:], zcol], axis=1) * m_ref[1:2, :]

    # cv2 ksize=3 Laplacian: 2 * (sum of 4 corners) - 8 * center
    lap = 2.0 * (left + right) - 8.0 * x

    o_ref[...] = jnp.clip((lap - 0.5) * 2.0, -1.0, 1.0).astype(o_ref.dtype)  # norm


def _pick_tb(nc: int, hw: int, itemsize: int) -> int:
    """Planes per grid step.

    The second-to-last block dim must be a multiple of 8 (sublane tiling) or
    equal the full NC dim.  Size so double-buffered in+out tiles stay well
    inside the scoped-VMEM defaults of all generations, and leave >=2 grid
    steps when possible so both v7x TensorCores get work.
    """
    if nc <= 8 or nc % 8 != 0:
        return nc                                   # full-dim block: always legal
    vmem_budget = 8 << 20                           # bytes for 2 x (in + out) tiles
    cap = max(8, (vmem_budget // (4 * hw * itemsize)) // 8 * 8)
    tb = min(nc // 2, cap)                          # >= 2 grid steps
    tb = max(8, (tb // 8) * 8)
    while nc % tb:                                  # evenly dividing blocks
        tb -= 8
    return tb


def vision_op_layer(x, is_denorm: int = 1):
    """x: (N, C, H, W) float array. Returns (N, C, H, W)."""
    N, C, H, W = x.shape
    NC, HW = N * C, H * W
    itemsize = jnp.dtype(x.dtype).itemsize

    xf = x.reshape(NC, HW)                          # free, contiguous reshape

    # Lane masks that zero the row-wrap of the +-1 flat shifts (image L/R border).
    j = jnp.arange(HW, dtype=jnp.int32) % W
    masks = jnp.stack([j != 0, j != W - 1]).astype(jnp.float32)   # (2, HW)

    tb = _pick_tb(NC, HW, itemsize)
    grid = (NC // tb,)

    vmem_limit = int(min(48 << 20, max(16 << 20, 6 * tb * HW * itemsize + (4 << 20))))

    out = pl.pallas_call(
        functools.partial(_vision_op_kernel, W=W, do_denorm=(is_denorm == 1)),
        out_shape=jax.ShapeDtypeStruct((NC, HW), x.dtype),
        grid=grid,
        in_specs=[
            pl.BlockSpec((2, HW), lambda i: (0, 0)),      # tiny constant masks
            pl.BlockSpec((tb, HW), lambda i: (i, 0)),     # TB planes, lane-dense
        ],
        out_specs=pl.BlockSpec((tb, HW), lambda i: (i, 0)),
        compiler_params=pltpu.CompilerParams(
            dimension_semantics=("parallel",),
            vmem_limit_bytes=vmem_limit,
        ),
        cost_estimate=pl.CostEstimate(
            flops=12 * NC * HW,
            transcendentals=0,
            bytes_accessed=2 * NC * HW * itemsize + 2 * HW * 4,
        ),
    )(masks, xf)
    return out.reshape(N, C, H, W)


def _reference(x, is_denorm: int = 1):
    """Plain-JAX reference of the same semantics, for validation."""
    if is_denorm == 1:
        x = jnp.clip((x + 1.0) * 0.5, 0.0, 1.0)
    N, C, H, W = x.shape
    xp = jnp.pad(x, ((0, 0), (0, 0), (1, 1), (1, 1)))
    lap = (2.0 * (xp[:, :, 0:H, 0:W] + xp[:, :, 0:H, 2:W + 2]
                  + xp[:, :, 2:H + 2, 0:W] + xp[:, :, 2:H + 2, 2:W + 2])
           - 8.0 * xp[:, :, 1:H + 1, 1:W + 1])
    return jnp.clip((lap - 0.5) * 2.0, -1.0, 1.0)


if __name__ == "__main__":
    key = jax.random.PRNGKey(0)
    x = jax.random.uniform(key, (2, 4, 16, 16), jnp.float32, minval=-1.0, maxval=1.0)

    y = vision_op_layer(x, is_denorm=1)
    jax.block_until_ready(y)
    y_ref = _reference(x, is_denorm=1)
    assert y.shape == x.shape and y.dtype == x.dtype
    assert jnp.max(jnp.abs(y - y_ref)) < 1e-5

    y0 = vision_op_layer(x, is_denorm=0)
    jax.block_until_ready(y0)
    y0_ref = _reference(x, is_denorm=0)
    assert jnp.max(jnp.abs(y0 - y0_ref)) < 1e-5

    print("KERNEL_OK")
</pallas_src>

<mosaic_0001>
module attributes {stable_mosaic.version = 11 : i64} {
  func.func @_vision_op_kernel(%arg0: i32, %arg1: memref<2x256xf32, #tpu.memory_space<vmem>>, %arg2: memref<8x256xf32, #tpu.memory_space<vmem>>, %arg3: memref<8x256xf32, #tpu.memory_space<vmem>>) attributes {dimension_semantics = [#tpu.dimension_semantics<parallel>], iteration_bounds = array<i64: 1>, scalar_prefetch = 0 : i64, scratch_operands = 0 : i64, tpu.core_type = #tpu.core_type<tc>, window_params = [{pipeline_mode = #tpu.pipeline_mode<synchronous>, transform_indices = @transform_0, window_bounds = array<i64: 2, 256>}, {transform_indices = @transform_1, window_bounds = array<i64: 8, 256>}, {transform_indices = @transform_2, window_bounds = array<i64: 8, 256>}]} {
    %c0 = arith.constant 0 : index
    %c0_0 = arith.constant 0 : index
    %0 = vector.load %arg2[%c0, %c0_0] : memref<8x256xf32, #tpu.memory_space<vmem>>, vector<8x256xf32>
    %cst = arith.constant 1.000000e+00 : f32
    %1 = vector.broadcast %cst : f32 to vector<8x256xf32>
    %2 = arith.addf %0, %1 : vector<8x256xf32>
    %cst_1 = arith.constant 5.000000e-01 : f32
    %3 = vector.broadcast %cst_1 : f32 to vector<8x256xf32>
    %4 = arith.mulf %2, %3 : vector<8x256xf32>
    %cst_2 = arith.constant 0.000000e+00 : f32
    %cst_3 = arith.constant 1.000000e+00 : f32
    %5 = vector.broadcast %cst_2 : f32 to vector<8x256xf32>
    %6 = arith.maximumf %5, %4 : vector<8x256xf32>
    %7 = vector.broadcast %cst_3 : f32 to vector<8x256xf32>
    %8 = arith.minimumf %7, %6 : vector<8x256xf32>
    %cst_4 = arith.constant 0.000000e+00 : f32
    %9 = vector.broadcast %cst_4 : f32 to vector<8x16xf32>
    %10 = vector.extract_strided_slice %8 {offsets = [0, 0], sizes = [8, 240], strides = [1, 1]} : vector<8x256xf32> to vector<8x240xf32>
    %11 = tpu.concatenate %9, %10 in 1 : vector<8x16xf32>, vector<8x240xf32> -> vector<8x256xf32>
    %12 = vector.extract_strided_slice %8 {offsets = [0, 16], sizes = [8, 240], strides = [1, 1]} : vector<8x256xf32> to vector<8x240xf32>
    %13 = tpu.concatenate %12, %9 in 1 : vector<8x240xf32>, vector<8x16xf32> -> vector<8x256xf32>
    %14 = arith.addf %11, %13 : vector<8x256xf32>
    %cst_5 = arith.constant 0.000000e+00 : f32
    %15 = vector.broadcast %cst_5 : f32 to vector<8x1xf32>
    %16 = vector.extract_strided_slice %14 {offsets = [0, 0], sizes = [8, 255], strides = [1, 1]} : vector<8x256xf32> to vector<8x255xf32>
    %17 = tpu.concatenate %15, %16 in 1 : vector<8x1xf32>, vector<8x255xf32> -> vector<8x256xf32>
    %c0_6 = arith.constant 0 : index
    %c0_7 = arith.constant 0 : index
    %18 = vector.load %arg1[%c0_6, %c0_7] : memref<2x256xf32, #tpu.memory_space<vmem>>, vector<1x256xf32>
    %19 = vector.broadcast %18 : vector<1x256xf32> to vector<8x256xf32>
    %20 = arith.mulf %17, %19 : vector<8x256xf32>
    %21 = vector.extract_strided_slice %14 {offsets = [0, 1], sizes = [8, 255], strides = [1, 1]} : vector<8x256xf32> to vector<8x255xf32>
    %22 = tpu.concatenate %21, %15 in 1 : vector<8x255xf32>, vector<8x1xf32> -> vector<8x256xf32>
    %c1 = arith.constant 1 : index
    %c0_8 = arith.constant 0 : index
    %23 = vector.load %arg1[%c1, %c0_8] : memref<2x256xf32, #tpu.memory_space<vmem>>, vector<1x256xf32>
    %24 = vector.broadcast %23 : vector<1x256xf32> to vector<8x256xf32>
    %25 = arith.mulf %22, %24 : vector<8x256xf32>
    %26 = arith.addf %20, %25 : vector<8x256xf32>
    %cst_9 = arith.constant 2.000000e+00 : f32
    %27 = vector.broadcast %cst_9 : f32 to vector<8x256xf32>
    %28 = arith.mulf %27, %26 : vector<8x256xf32>
    %cst_10 = arith.constant 8.000000e+00 : f32
    %29 = vector.broadcast %cst_10 : f32 to vector<8x256xf32>
    %30 = arith.mulf %29, %8 : vector<8x256xf32>
    %31 = arith.subf %28, %30 : vector<8x256xf32>
    %cst_11 = arith.constant 5.000000e-01 : f32
    %32 = vector.broadcast %cst_11 : f32 to vector<8x256xf32>
    %33 = arith.subf %31, %32 : vector<8x256xf32>
    %cst_12 = arith.constant 2.000000e+00 : f32
    %34 = vector.broadcast %cst_12 : f32 to vector<8x256xf32>
    %35 = arith.mulf %33, %34 : vector<8x256xf32>
    %cst_13 = arith.constant -1.000000e+00 : f32
    %cst_14 = arith.constant 1.000000e+00 : f32
    %36 = vector.broadcast %cst_13 : f32 to vector<8x256xf32>
    %37 = arith.maximumf %36, %35 : vector<8x256xf32>
    %38 = vector.broadcast %cst_14 : f32 to vector<8x256xf32>
    %39 = arith.minimumf %38, %37 : vector<8x256xf32>
    %c0_15 = arith.constant 0 : index
    %c0_16 = arith.constant 0 : index
    %40 = vector.load %arg3[%c0_15, %c0_16] : memref<8x256xf32, #tpu.memory_space<vmem>>, vector<8x256xf32>
    tpu.vector_store %arg3[%c0_15, %c0_16], %39 {strides = array<i32>} : memref<8x256xf32, #tpu.memory_space<vmem>>, vector<8x256xf32>,
    return
  }
  func.func @transform_0(%arg0: i32) -> (i32, i32) {
    %c0_i32 = arith.constant 0 : i32
    %c0_i32_0 = arith.constant 0 : i32
    %c0_i32_1 = arith.constant 0 : i32
    return %c0_i32, %c0_i32_0 : i32, i32
  }
  func.func @transform_1(%arg0: i32) -> (i32, i32) {
    %c0_i32 = arith.constant 0 : i32
    %c0_i32_0 = arith.constant 0 : i32
    return %arg0, %c0_i32 : i32, i32
  }
  func.func @transform_2(%arg0: i32) -> (i32, i32) {
    %c0_i32 = arith.constant 0 : i32
    %c0_i32_0 = arith.constant 0 : i32
    return %arg0, %c0_i32 : i32, i32
  }
}

</mosaic_0001>

<bundles_post_ra>
// kernel: tpu_custom_call.1
= control target key start
LH: loop header
LB: loop body
LE: loop exit
PB: predicated region body
PF: predicated region fallthrough
CT: control target
= control target key end

     0   :  { %7 = vsyncpa [#allocation3], 0  ;;  %s292_s0 = inlined_call_operand.hbm [shape: f32[2,256], index: 0, kind: input, shape index: {}]   ;;  %s293_s1 = inlined_call_operand.hbm [shape: f32[8,256], index: 1, kind: input, shape index: {}]   ;;  %s294_s2 = inlined_call_operand.hbm [shape: f32[8,256], index: 2, kind: output, shape index: {}]  }
   0x1   :  { %8 = vsyncpa [#allocation6], 0 }
   0x2   :  { %9 = vsyncpa [#allocation4], 0  ;;  %s234_s9 = smov [#allocation2]   ;;  %s235_s11 = smov [#allocation5]  }
   0x3   :  { %s16_s10 = sshll.u32 %s234_s9, 4  ;;  %s26_s12 = sshll.u32 %s235_s11, 4  ;;  %s17_s10 = int_to_ptr.vmem [resolvable:$true] %s16_s10  ;;  %s27_s12 = int_to_ptr.vmem [resolvable:$true] %s26_s12 }
   0x4   :  { %s162_s15 = scalar_lea.hbm %s292_s0, 64 }
   0x5   :  { %p163_p0 = scmp.ne.s32.totalorder %s292_s0, %s162_s15  ;;  %p166_p1 = scmp.lt.u32.totalorder %s162_s15, %s292_s0 }
   0x7   :  { %p168_p2 = pnand %p166_p1, %p163_p0 }
   0x9   :  { %171 = shalt.err (!%p168_p2)
}
   0xa   :  { %s172_s20 = scalar_lea.vmem %s17_s10, 64  ;;  %p177_p4 = scmp.lt.s32.totalorder %s17_s10, %s17_s10 }
   0xb   :  { %p173_p3 = scmp.ne.s32.totalorder %s17_s10, %s172_s20  ;;  %p178_p5 = scmp.lt.s32.totalorder %s172_s20, %s172_s20 }
   0xd   :  { %p179_p6 = por %p178_p5, %p177_p4 }
   0xf   :  { %p180_p7 = pnand %p179_p6, %p173_p3 }
  0x11   :  { %183 = shalt.err (!%p180_p7)
}
  0x12   :  { %19 = dma.hbm_to_vmem [thread:$0]  %s292_s0, 64, %s17_s10, [#allocation3]  }
  0x13   :  { %s184_s25 = scalar_lea.hbm %s293_s1, 256 }
  0x14   :  { %p185_p8 = scmp.ne.s32.totalorder %s293_s1, %s184_s25  ;;  %p188_p9 = scmp.lt.u32.totalorder %s184_s25, %s293_s1 }
  0x16   :  { %p190_p10 = pnand %p188_p9, %p185_p8 }
  0x18   :  { %193 = shalt.err (!%p190_p10)
}
  0x19   :  { %s194_s30 = scalar_lea.vmem %s27_s12, 256  ;;  %p199_p12 = scmp.lt.s32.totalorder %s27_s12, %s27_s12 }
  0x1a   :  { %p195_p11 = scmp.ne.s32.totalorder %s27_s12, %s194_s30  ;;  %p200_p13 = scmp.lt.s32.totalorder %s194_s30, %s194_s30 }
  0x1c   :  { %p201_p0 = por %p200_p13, %p199_p12 }
  0x1e   :  { %p202_p1 = pnand %p201_p0, %p195_p11 }
  0x20   :  { %205 = shalt.err (!%p202_p1)
}
  0x21   :  { %29 = dma.hbm_to_vmem [thread:$0]  %s293_s1, 256, %s27_s12, [#allocation6]  }
  0x22   :  { %228 = dma.done.wait [#allocation3], 64  }
  0x23   :  { %229 = vsyncadd [#allocation3], 4294967232 }
  0x24   :  { %230 = dma.done.wait [#allocation6], 256  }
  0x25   :  { %231 = vsyncadd [#allocation6], 4294967040  ;;  %v36_v0 = vld [vmem:[#allocation5] sm:$0xff]  ;;  %v37_v1 = vld [vmem:[#allocation5 + $0x8] sm:$0xff]  ;;  %s236_s4 = smov 112   ;;  %s237_s5 = smov 16   ;;  %v81_v20 = vlaneseq }
  0x26   :  { %v38_v2 = vadd.f32 1.0, %v36_v0  ;;  %v39_v3 = vadd.f32 1.0, %v37_v1  ;;  %vm52_vm0 = vcmask 130048   ;;  %vm61_vm1 = vcmask 916480   ;;  %s238_s1 = smov 1   ;;  %s239_s6 = smov 127  }
  0x27   :  { %v82_v21 = vshrl.u32 %v81_v20, 7  ;;  %v79_v23 = vld [vmem:[#allocation2] ss:$2 sm:$0x3]  ;;  %vm74_vm2 = vcmask 7168   ;;  %vm97_vm3 = vcmask 1039360  }
  0x28   :  { %v40_v4 = vmul.f32 0.5, %v38_v2  ;;  %v41_v5 = vmul.f32 0.5, %v39_v3  ;;  %v103_v25 = vld [vmem:[#allocation2 + $0x1] ss:$2 sm:$0x3]  ;;  %s240_s7 = smov [#allocation7]  }
  0x29   :  { %v83_v22 = vsub.s32 0, %v82_v21  ;;  %v87_v24 = vsub.s32 1, %v82_v21  ;;  %s141_s8 = sshll.u32 %s240_s7, 4  ;;  %s142_s8 = int_to_ptr.vmem [resolvable:$true] %s141_s8 }
  0x2a   :  { %v42_v6 = vmax.f32 %v40_v4, 0.0  ;;  %v43_v7 = vmax.f32 %v41_v5, 0.0  ;;  %s206_s9 = scalar_lea.vmem %s142_s8, 256  ;;  %p211_p3 = scmp.lt.s32.totalorder %s142_s8, %s142_s8 }
  0x2b   :  { %v84_v28 = vrot.slane %v79_v23, %v83_v22  ;;  %v88_v29 = vrot.slane %v79_v23, %v87_v24  ;;  %v112_v30 = vrot.slane %v103_v25, %v87_v24  ;;  %v108_v31 = vrot.slane %v103_v25, %v83_v22  ;;  %p207_p2 = scmp.ne.s32.totalorder %s142_s8, %s206_s9  ;;  %p212_p4 = scmp.lt.s32.totalorder %s206_s9, %s206_s9 }
  0x2c   :  { %v44_v8 = vmin.f32 %v42_v6, 1.0  ;;  %v45_v9 = vmin.f32 %v43_v7, 1.0 }
  0x2d   :  { %p213_p5 = por %p212_p4, %p211_p3 }
  0x2e   :  { %57 = vrot.lane.b32.xlu1 %v44_v8, %s236_s4  ;;  %48 = vrot.lane.b32.xlu0 %v44_v8, %s237_s5  ;;  %v121_v42 = vmul.f32 8.0, %v44_v8  ;;  %v122_v43 = vmul.f32 8.0, %v45_v9 }
  0x2f   :  { %p214_p6 = pnand %p213_p5, %p207_p2 }
  0x32   :  { %59 = vrot.lane.b32.xlu1 %v45_v9, %s236_s4  ;;  %50 = vrot.lane.b32.xlu0 %v45_v9, %s237_s5 }
  0xa0   :  { %v58_v10 = vpop.permute.xlu1 %57  ;;  %v49_v11 = vpop.permute.xlu0 %48 }
  0xa1   :  { %v56_v14 = vsel %vm52_vm0, 0.0, %v49_v11 }
  0xa4   :  { %v60_v12 = vpop.permute.xlu1 %59  ;;  %v51_v13 = vpop.permute.xlu0 %50 }
  0xa5   :  { %v62_v15 = vsel %vm61_vm1, %v58_v10, %v60_v12  ;;  %v65_v16 = vsel %vm61_vm1, %v60_v12, 0.0  ;;  %v53_v17 = vsel %vm52_vm0, %v49_v11, %v51_v13 }
  0xa6   :  { %v66_v18 = vadd.f32 %v62_v15, %v56_v14  ;;  %v67_v19 = vadd.f32 %v65_v16, %v53_v17 }
  0xa8   :  { %70 = vrot.lane.b32.xlu0 %v66_v18, %s238_s1  ;;  %72 = vrot.lane.b32.xlu1 %v67_v19, %s238_s1 }
  0xac   :  { %93 = vrot.lane.b32.xlu0 %v66_v18, %s239_s6  ;;  %95 = vrot.lane.b32.xlu1 %v67_v19, %s239_s6 }
 0x11a   :  { %v73_v26 = vpop.permute.xlu1 %72  ;;  %v71_v27 = vpop.permute.xlu0 %70 }
 0x11b   :  { %v75_v32 = vsel %vm74_vm2, %v71_v27, %v73_v26  ;;  %v78_v33 = vsel %vm74_vm2, 0.0, %v71_v27 }
 0x11c   :  { %v91_v38 = vmul.f32 %v84_v28, %v78_v33  ;;  %v92_v39 = vmul.f32 %v88_v29, %v75_v32 }
 0x11e   :  { %v96_v34 = vpop.permute.xlu1 %95  ;;  %v94_v35 = vpop.permute.xlu0 %93 }
 0x11f   :  { %v101_v36 = vsel %vm97_vm3, %v96_v34, 0.0  ;;  %v98_v37 = vsel %vm97_vm3, %v94_v35, %v96_v34 }
 0x120   :  { %v116_v40 = vmul.f32 %v112_v30, %v101_v36  ;;  %v115_v41 = vmul.f32 %v108_v31, %v98_v37 }
 0x122   :  { %v118_v44 = vadd.f32 %v116_v40, %v92_v39  ;;  %v117_v45 = vadd.f32 %v115_v41, %v91_v38 }
 0x124   :  { %v120_v46 = vmul.f32 2.0, %v118_v44  ;;  %v119_v47 = vmul.f32 2.0, %v117_v45 }
 0x126   :  { %v124_v48 = vsub.f32 %v120_v46, %v122_v43  ;;  %v123_v49 = vsub.f32 %v119_v47, %v121_v42 }
 0x128   :  { %v151_v50 = vadd.f32 -0.5, %v123_v49  ;;  %v152_v51 = vadd.f32 -0.5, %v124_v48 }
 0x12a   :  { %v127_v52 = vmul.f32 2.0, %v151_v50  ;;  %v128_v53 = vmul.f32 2.0, %v152_v51 }
 0x12c   :  { %v153_v54 = vclamps-f32 %v127_v52, 1.0  ;;  %v154_v55 = vclamps-f32 %v128_v53, 1.0 }
 0x12e   :  { %133 = vst [vmem:[#allocation7] sm:$0xff] %v153_v54  ;;  %134 = vst [vmem:[#allocation7 + $0x8] sm:$0xff] %v154_v55 }
 0x12f   :  { %217 = shalt.err (!%p214_p6)
}
 0x130   :  { %s218_s12 = scalar_lea.hbm %s294_s2, 256 }
 0x131   :  { %p219_p7 = scmp.ne.s32.totalorder %s294_s2, %s218_s12  ;;  %p222_p8 = scmp.lt.u32.totalorder %s218_s12, %s294_s2 }
 0x133   :  { %p224_p9 = pnand %p222_p8, %p219_p7 }
 0x135   :  { %227 = shalt.err (!%p224_p9)
}
 0x136   :  { %144 = dma.vmem_to_hbm [thread:$0]  %s142_s8, 256, %s294_s2, [#allocation4]  }
 0x137   :  { %232 = dma.done.wait [#allocation4], 256  }
 0x138   :  { %233 = vsyncadd [#allocation4], 4294967040 }
 0x139   :  { %148 = vsyncpa [#allocation3], 1 }
 0x13a   :  { %149 = vsyncpa [#allocation6], 1 }
 0x13b   :  { %150 = vsyncpa [#allocation4], 1 }

</bundles_post_ra>
